<compile_context>
chip_gen: v7x
topology: tpu7x:2x2x1
jax: 0.10.0
libtpu: 0.0.40
codegen_flags: <defaults>
</compile_context>

<pallas_src>
import jax
import jax.numpy as jnp
from jax.experimental import pallas as pl
from jax.experimental.pallas import tpu as pltpu

SIZE = 2   # Model(size=2): v3 = v1[:, 0:SIZE]
D = 128    # trailing feature dim -> TPU lanes


def concat_kernel(x1_ref, x2_ref, x3_ref, x4_ref, x5_ref, out_ref):
    # Inputs arrive lane-flattened: (B, c_i * D).  The PyTorch dim=1 concat is
    # therefore a last-axis (lane) concat at 128-aligned offsets.
    pieces = [r[...] for r in (x1_ref, x2_ref, x3_ref, x4_ref, x5_ref)]

    # v2 = v1[:, 0:INT64_MAX] is a no-op.  v3 = v1[:, 0:SIZE] is rebuilt
    # directly from the input values already in registers (single pass); all
    # slice bounds are static multiples of 128 lanes.
    tail, remaining = [], SIZE * D
    for p in pieces:
        if remaining <= 0:
            break
        take = min(p.shape[-1], remaining)
        tail.append(p if take == p.shape[-1] else p[:, :take])
        remaining -= take

    # One unmasked, lane-dense store of the whole output tile (write-only out).
    out_ref[...] = jnp.concatenate(pieces + tail, axis=-1)


def model_forward(x1, x2, x3, x4, x5):
    xs = (x1, x2, x3, x4, x5)
    B = x1.shape[0]
    dtype = x1.dtype
    assert all(x.dtype == dtype for x in xs), "mixed dtypes would silently downcast"
    assert all(x.shape[0] == B and x.shape[2] == D for x in xs)

    total_c = sum(x.shape[1] for x in xs)
    out_c = total_c + SIZE

    # Lane-flatten (B, c, D) -> (B, c*D): row-major reshape, free in XLA.
    flat = [x.reshape(B, x.shape[1] * D) for x in xs]

    in_bytes = sum(x.size * x.dtype.itemsize for x in xs)
    out_bytes = B * out_c * D * jnp.dtype(dtype).itemsize

    out_flat = pl.pallas_call(
        concat_kernel,
        out_shape=jax.ShapeDtypeStruct((B, out_c * D), dtype),
        in_specs=[pl.BlockSpec(memory_space=pltpu.MemorySpace.VMEM)] * 5,
        out_specs=pl.BlockSpec(memory_space=pltpu.MemorySpace.VMEM),
        cost_estimate=pl.CostEstimate(
            flops=0, transcendentals=0, bytes_accessed=in_bytes + out_bytes),
    )(*flat)

    # TODO(synk): at ~17 KB total, a plain jnp.concatenate (no custom-call
    # boundary, no 6 tiny DMAs) is strictly faster; keep this Pallas path for
    # scaled-up shapes.  When B/D scale: add a grid over B with
    # dimension_semantics=("parallel",) (shards across v7x's 2 TCs), size the
    # per-step footprint for v7x's 64 MiB VMEM, keep >=512-row tiles for the
    # v5e/v6e HBM roofline, or switch to memory_space=pl.ANY + HBM->HBM
    # make_async_copy per piece to skip VMEM staging entirely.
    return out_flat.reshape(B, out_c, D)


def reference_forward(x1, x2, x3, x4, x5):
    v1 = jnp.concatenate([x1, x2, x3, x4, x5], axis=1)
    v3 = v1[:, 0:SIZE]
    return jnp.concatenate([v1, v3], axis=1)


if __name__ == "__main__":
    key = jax.random.PRNGKey(0)
    B = 2
    channels = (1, 2, 3, 4, 5)  # dim-1 sizes matching the fuzz inputs
    keys = jax.random.split(key, len(channels))
    xs = [jax.random.normal(k, (B, c, D), dtype=jnp.float32)
          for k, c in zip(keys, channels)]

    out = jax.block_until_ready(model_forward(*xs))
    ref = reference_forward(*xs)

    assert out.shape == (B, sum(channels) + SIZE, D), out.shape
    assert jnp.array_equal(out, ref), "mismatch vs reference (bit-exact)"
    print("KERNEL_OK")
</pallas_src>

<mosaic_0001>
module attributes {stable_mosaic.version = 11 : i64} {
  func.func @concat_kernel(%arg0: memref<2x128xf32, #tpu.memory_space<vmem>>, %arg1: memref<2x256xf32, #tpu.memory_space<vmem>>, %arg2: memref<2x384xf32, #tpu.memory_space<vmem>>, %arg3: memref<2x512xf32, #tpu.memory_space<vmem>>, %arg4: memref<2x640xf32, #tpu.memory_space<vmem>>, %arg5: memref<2x2176xf32, #tpu.memory_space<vmem>>) attributes {dimension_semantics = [], scalar_prefetch = 0 : i64, scratch_operands = 0 : i64, tpu.core_type = #tpu.core_type<tc>} {
    %c0 = arith.constant 0 : index
    %c0_0 = arith.constant 0 : index
    %0 = vector.load %arg0[%c0, %c0_0] : memref<2x128xf32, #tpu.memory_space<vmem>>, vector<2x128xf32>
    %c0_1 = arith.constant 0 : index
    %c0_2 = arith.constant 0 : index
    %1 = vector.load %arg1[%c0_1, %c0_2] : memref<2x256xf32, #tpu.memory_space<vmem>>, vector<2x256xf32>
    %c0_3 = arith.constant 0 : index
    %c0_4 = arith.constant 0 : index
    %2 = vector.load %arg2[%c0_3, %c0_4] : memref<2x384xf32, #tpu.memory_space<vmem>>, vector<2x384xf32>
    %c0_5 = arith.constant 0 : index
    %c0_6 = arith.constant 0 : index
    %3 = vector.load %arg3[%c0_5, %c0_6] : memref<2x512xf32, #tpu.memory_space<vmem>>, vector<2x512xf32>
    %c0_7 = arith.constant 0 : index
    %c0_8 = arith.constant 0 : index
    %4 = vector.load %arg4[%c0_7, %c0_8] : memref<2x640xf32, #tpu.memory_space<vmem>>, vector<2x640xf32>
    %5 = vector.extract_strided_slice %1 {offsets = [0, 0], sizes = [2, 128], strides = [1, 1]} : vector<2x256xf32> to vector<2x128xf32>
    %6 = tpu.concatenate %0, %1, %2, %3, %4, %0, %5 in 1 : vector<2x128xf32>, vector<2x256xf32>, vector<2x384xf32>, vector<2x512xf32>, vector<2x640xf32>, vector<2x128xf32>, vector<2x128xf32> -> vector<2x2176xf32>
    %c0_9 = arith.constant 0 : index
    %c0_10 = arith.constant 0 : index
    %7 = vector.load %arg5[%c0_9, %c0_10] : memref<2x2176xf32, #tpu.memory_space<vmem>>, vector<2x2176xf32>
    tpu.vector_store %arg5[%c0_9, %c0_10], %6 {strides = array<i32>} : memref<2x2176xf32, #tpu.memory_space<vmem>>, vector<2x2176xf32>,
    return
  }
}

</mosaic_0001>

<bundles_post_ra>
// kernel: tpu_custom_call.1
= control target key start
LH: loop header
LB: loop body
LE: loop exit
PB: predicated region body
PF: predicated region fallthrough
CT: control target
= control target key end

     0   :  { %10 = vsyncpa [#allocation3], 0  ;;  %s471_s0 = inlined_call_operand.hbm [shape: f32[2,128], index: 0, kind: input, shape index: {}]   ;;  %s472_s1 = inlined_call_operand.hbm [shape: f32[2,256], index: 1, kind: input, shape index: {}]   ;;  %s473_s2 = inlined_call_operand.hbm [shape: f32[2,384], index: 2, kind: input, shape index: {}]   ;;  %s474_s3 = inlined_call_operand.hbm [shape: f32[2,512], index: 3, kind: input, shape index: {}]   ;;  %s475_s4 = inlined_call_operand.vmem [shape: f32[2,640], index: 4, kind: input, shape index: {}]   ;;  %s476_s5 = inlined_call_operand.hbm [shape: f32[2,2176], index: 5, kind: output, shape index: {}]  }
   0x1   :  { %11 = vsyncpa [#allocation6], 0 }
   0x2   :  { %12 = vsyncpa [#allocation9], 0 }
   0x3   :  { %13 = vsyncpa [#allocation4], 0  ;;  %s369_s18 = smov [#allocation5]   ;;  %s370_s20 = smov [#allocation2]  }
   0x4   :  { %s30_s19 = sshll.u32 %s369_s18, 4  ;;  %s20_s21 = sshll.u32 %s370_s20, 4  ;;  %s31_s19 = int_to_ptr.vmem [resolvable:$true] %s30_s19  ;;  %s21_s21 = int_to_ptr.vmem [resolvable:$true] %s20_s21 }
   0x5   :  { %s251_s24 = scalar_lea.hbm %s472_s1, 64 }
   0x6   :  { %p252_p0 = scmp.ne.s32.totalorder %s472_s1, %s251_s24  ;;  %p255_p1 = scmp.lt.u32.totalorder %s251_s24, %s472_s1 }
   0x8   :  { %p257_p2 = pnand %p255_p1, %p252_p0 }
   0xa   :  { %260 = shalt.err (!%p257_p2)
}
   0xb   :  { %s261_s29 = scalar_lea.vmem %s31_s19, 64  ;;  %p266_p4 = scmp.lt.s32.totalorder %s31_s19, %s31_s19 }
   0xc   :  { %p262_p3 = scmp.ne.s32.totalorder %s31_s19, %s261_s29  ;;  %p267_p5 = scmp.lt.s32.totalorder %s261_s29, %s261_s29 }
   0xe   :  { %p268_p6 = por %p267_p5, %p266_p4 }
  0x10   :  { %p269_p7 = pnand %p268_p6, %p262_p3 }
  0x12   :  { %272 = shalt.err (!%p269_p7)
}
  0x13   :  { %33 = dma.hbm_to_vmem [thread:$0]  %s472_s1, 64, %s31_s19, [#allocation6]  }
  0x14   :  { %s273_s9 = scalar_lea.hbm %s471_s0, 32 }
  0x15   :  { %p274_p8 = scmp.ne.s32.totalorder %s471_s0, %s273_s9  ;;  %p277_p9 = scmp.lt.u32.totalorder %s273_s9, %s471_s0 }
  0x17   :  { %p279_p10 = pnand %p277_p9, %p274_p8 }
  0x19   :  { %282 = shalt.err (!%p279_p10)
}
  0x1a   :  { %s283_s14 = scalar_lea.vmem %s21_s21, 32  ;;  %p288_p12 = scmp.lt.s32.totalorder %s21_s21, %s21_s21 }
  0x1b   :  { %p284_p11 = scmp.ne.s32.totalorder %s21_s21, %s283_s14  ;;  %p289_p13 = scmp.lt.s32.totalorder %s283_s14, %s283_s14 }
  0x1d   :  { %p290_p0 = por %p289_p13, %p288_p12 }
  0x1f   :  { %p291_p1 = pnand %p290_p0, %p284_p11 }
  0x21   :  { %294 = shalt.err (!%p291_p1)
}
  0x22   :  { %23 = dma.hbm_to_vmem [thread:$0]  %s471_s0, 32, %s21_s21, [#allocation3]  }
  0x23   :  { %s371_s16 = smov [#allocation7]   ;;  %s372_s18 = smov [#allocation8]  }
  0x24   :  { %s40_s17 = sshll.u32 %s371_s16, 4  ;;  %s50_s19 = sshll.u32 %s372_s18, 4  ;;  %s41_s17 = int_to_ptr.vmem [resolvable:$true] %s40_s17  ;;  %s51_s19 = int_to_ptr.vmem [resolvable:$true] %s50_s19 }
  0x25   :  { %s295_s23 = scalar_lea.hbm %s473_s2, 96 }
  0x26   :  { %p296_p2 = scmp.ne.s32.totalorder %s473_s2, %s295_s23  ;;  %p299_p3 = scmp.lt.u32.totalorder %s295_s23, %s473_s2 }
  0x28   :  { %p301_p4 = pnand %p299_p3, %p296_p2 }
  0x2a   :  { %304 = shalt.err (!%p301_p4)
}
  0x2b   :  { %s305_s0 = scalar_lea.vmem %s41_s17, 96  ;;  %p310_p6 = scmp.lt.s32.totalorder %s41_s17, %s41_s17 }
  0x2c   :  { %p306_p5 = scmp.ne.s32.totalorder %s41_s17, %s305_s0  ;;  %p311_p7 = scmp.lt.s32.totalorder %s305_s0, %s305_s0 }
  0x2e   :  { %p312_p8 = por %p311_p7, %p310_p6 }
  0x30   :  { %p313_p9 = pnand %p312_p8, %p306_p5 }
  0x32   :  { %316 = shalt.err (!%p313_p9)
}
  0x33   :  { %43 = dma.hbm_to_vmem [thread:$0]  %s473_s2, 96, %s41_s17, [#allocation6]  }
  0x34   :  { %s317_s6 = scalar_lea.hbm %s474_s3, 128 }
  0x35   :  { %p318_p10 = scmp.ne.s32.totalorder %s474_s3, %s317_s6  ;;  %p321_p11 = scmp.lt.u32.totalorder %s317_s6, %s474_s3 }
  0x37   :  { %p323_p12 = pnand %p321_p11, %p318_p10 }
  0x39   :  { %326 = shalt.err (!%p323_p12)
}
  0x3a   :  { %s327_s11 = scalar_lea.vmem %s51_s19, 128  ;;  %p332_p0 = scmp.lt.s32.totalorder %s51_s19, %s51_s19 }
  0x3b   :  { %p328_p13 = scmp.ne.s32.totalorder %s51_s19, %s327_s11  ;;  %p333_p1 = scmp.lt.s32.totalorder %s327_s11, %s327_s11 }
  0x3d   :  { %p334_p2 = por %p333_p1, %p332_p0 }
  0x3f   :  { %p335_p3 = pnand %p334_p2, %p328_p13 }
  0x41   :  { %338 = shalt.err (!%p335_p3)
}
  0x42   :  { %53 = dma.hbm_to_vmem [thread:$0]  %s474_s3, 128, %s51_s19, [#allocation9]  }
  0x43   :  { %361 = dma.done.wait [#allocation3], 32  }
  0x44   :  { %362 = vsyncadd [#allocation3], 4294967264 }
  0x45   :  { %363 = dma.done.wait [#allocation6], 160  }
  0x46   :  { %364 = vsyncadd [#allocation6], 4294967136 }
  0x47   :  { %365 = dma.done.wait [#allocation9], 128  }
  0x48   :  { %366 = vsyncadd [#allocation9], 4294967168  ;;  %v88_v0 = vlaneseq  ;;  %v373_v1 = vmov 1983009808   ;;  %v68_v6 = vld [vmem:[#allocation2] sm:$0x3] }
  0x49   :  { %v86_v2 = vunpack.c.l.s4 %v373_v1  ;;  %v240_v7 = vld.sshfl [vmem:[#allocation5] sm:$0x33 pattern:$0x76325410]  ;;  %v70_v8 = vld [vmem:[#allocation7] sm:$0x3f] }
  0x4a   :  { %v89_v3 = vshrl.u32 %v88_v0, 7  ;;  %v82_v9 = vcombine.high %v240_v7, %v240_v7  ;;  %v145_v10 = vcombine.low %v68_v6, %v240_v7  ;;  %222 = vst [vmem:[#allocation10 + $0x20] sm:$0x3] %v240_v7  ;;  %v71_v11 = vld [vmem:[#allocation8] sm:$0xff]  ;;  %v84_v14 = vcombine.high %v70_v8, %v70_v8 }
  0x4b   :  { %v87_v4 = vunpack.c.0.s8 %v86_v2  ;;  %v72_v12 = vld [vmem:[%s475_s4] sm:$0xff]  ;;  %v101_v16 = vcombine.high %v71_v11, %v71_v11  ;;  %v241_v17 = vld.sshfl [vmem:[%s475_s4 + $0x8] sm:$0x3 pattern:$0x76325410]  ;;  %s374_s4 = smov [#allocation10]  }
  0x4c   :  { %v120_v20 = vcombine.high %v72_v12, %v72_v12  ;;  %v197_v28 = vcombine.low %v241_v17, %v68_v6  ;;  %s229_s15 = sshll.u32 %s374_s4, 4  ;;  %s230_s15 = int_to_ptr.vmem [resolvable:$true] %s229_s15 }
  0x4d   :  { %v90_v5 = vsub.s32 %v87_v4, %v89_v3  ;;  %s339_s16 = scalar_lea.vmem %s230_s15, 544  ;;  %p344_p5 = scmp.lt.s32.totalorder %s230_s15, %s230_s15 }
  0x4e   :  { %p340_p4 = scmp.ne.s32.totalorder %s230_s15, %s339_s16  ;;  %p345_p6 = scmp.lt.s32.totalorder %s339_s16, %s339_s16 }
  0x4f   :  { %v91_v13 = vrot.slane %v70_v8, %v90_v5  ;;  %v108_v15 = vrot.slane %v71_v11, %v90_v5  ;;  %v153_v18 = vrot.slane %v145_v10, %v90_v5  ;;  %v127_v19 = vrot.slane %v72_v12, %v90_v5 }
  0x50   :  { %v98_v22 = vrot.slane %v84_v14, %v90_v5  ;;  %v115_v25 = vrot.slane %v101_v16, %v90_v5  ;;  %v134_v27 = vrot.slane %v120_v20, %v90_v5  ;;  %v211_v41 = vrot.slane %v197_v28, %v90_v5  ;;  %p346_p7 = por %p345_p6, %p344_p5 }
  0x51   :  { %v146_v21 = vcombine.low %v82_v9, %v91_v13  ;;  %v99_v23 = vcombine.high %v91_v13, %v91_v13  ;;  %v116_v24 = vcombine.high %v108_v15, %v108_v15  ;;  %v135_v26 = vcombine.high %v127_v19, %v127_v19 }
  0x52   :  { %v117_v32 = vcombine.high %v115_v25, %v115_v25  ;;  %v136_v34 = vcombine.high %v134_v27, %v134_v27  ;;  %p347_p8 = pnand %p346_p7, %p340_p4 }
  0x53   :  { %v160_v29 = vrot.slane %v146_v21, %v90_v5  ;;  %v162_v30 = vcombine.low %v99_v23, %v98_v22  ;;  %v163_v31 = vcombine.low %v108_v15, %v116_v24  ;;  %v180_v33 = vcombine.low %v127_v19, %v135_v26 }
  0x54   :  { %v179_v38 = vcombine.low %v115_v25, %v117_v32  ;;  %v196_v40 = vcombine.low %v134_v27, %v136_v34 }
  0x55   :  { %v161_v35 = vcombine.low %v153_v18, %v160_v29  ;;  %v170_v36 = vrot.slane %v162_v30, %v90_v5  ;;  %v177_v37 = vrot.slane %v163_v31, %v90_v5  ;;  %v194_v39 = vrot.slane %v180_v33, %v90_v5 }
  0x56   :  { %v187_v43 = vrot.slane %v179_v38, %v90_v5  ;;  %v204_v44 = vrot.slane %v196_v40, %v90_v5 }
  0x57   :  { %218 = vst [vmem:[#allocation10] sm:$0xff] %v161_v35  ;;  %v178_v42 = vcombine.low %v170_v36, %v177_v37 }
  0x58   :  { %v195_v45 = vcombine.low %v187_v43, %v194_v39  ;;  %v212_v46 = vcombine.low %v204_v44, %v211_v41 }
  0x59   :  { %219 = vst [vmem:[#allocation10 + $0x8] sm:$0xff] %v178_v42 }
  0x5a   :  { %220 = vst [vmem:[#allocation10 + $0x10] sm:$0xff] %v195_v45  ;;  %221 = vst [vmem:[#allocation10 + $0x18] sm:$0xff] %v212_v46 }
  0x5b   :  { %350 = shalt.err (!%p347_p8)
}
  0x5c   :  { %s351_s19 = scalar_lea.hbm %s476_s5, 544 }
  0x5d   :  { %p352_p9 = scmp.ne.s32.totalorder %s476_s5, %s351_s19  ;;  %p355_p10 = scmp.lt.u32.totalorder %s351_s19, %s476_s5 }
  0x5f   :  { %p357_p11 = pnand %p355_p10, %p352_p9 }
  0x61   :  { %360 = shalt.err (!%p357_p11)
}
  0x62   :  { %232 = dma.vmem_to_hbm [thread:$0]  %s230_s15, 544, %s476_s5, [#allocation4]  }
  0x63   :  { %367 = dma.done.wait [#allocation4], 544  }
  0x64   :  { %368 = vsyncadd [#allocation4], 4294966752 }
  0x65   :  { %236 = vsyncpa [#allocation3], 1 }
  0x66   :  { %237 = vsyncpa [#allocation6], 1 }
  0x67   :  { %238 = vsyncpa [#allocation9], 1 }
  0x68   :  { %239 = vsyncpa [#allocation4], 1 }

</bundles_post_ra>
